<compile_context>
chip_gen: v5e
topology: v5e:2x2
jax: 0.10.0
libtpu: 0.0.40
codegen_flags: <defaults>
</compile_context>

<pallas_src>
import jax
import jax.numpy as jnp
from jax.experimental import pallas as pl
from jax.experimental.pallas import tpu as pltpu

LANE = 128
SUBLANE = 8


def _round_up(n, m):
    return ((n + m - 1) // m) * m


def _vmem_tile_bytes(rows, cols, itemsize):
    """Physical VMEM footprint of a (rows, cols) tile (sublane/lane padded)."""
    return _round_up(max(rows, 1), SUBLANE) * _round_up(max(cols, 1), LANE) * itemsize


def _pick_block_batch(B, row_bytes, fixed_bytes, vmem_budget, max_tb=8192):
    """Largest TB with B % TB == 0 and (TB % 8 == 0 or TB == B) whose footprint fits."""
    divs = [tb for tb in range(1, B + 1)
            if B % tb == 0 and (tb % SUBLANE == 0 or tb == B)]
    fits = [tb for tb in divs
            if tb <= max_tb and fixed_bytes + tb * row_bytes <= vmem_budget]
    if not fits:
        return min(divs)
    tb = max(fits)
    # keep >= 2 grid steps in flight when that costs little (overlap / megacore balance)
    if tb == B and B > SUBLANE:
        smaller = [t for t in fits if t < B]
        if smaller and 2 * max(smaller) >= B:
            tb = max(smaller)
    return tb


# ----------------------------------------------------------------------------- #
# Kernel: one batch tile per grid step, everything lane-dense, no reshapes
# ----------------------------------------------------------------------------- #
def _deepsets_kernel(x_ref, m_ref, e_ref,
                     w1_ref, b1_ref, w2_ref, b2_ref,
                     w20_ref, b20_ref, w21_ref, b21_ref,
                     out_ref):
    # x_ref  : (TB, S*D_in)   lane-packed set elements (compute dtype = x.dtype)
    # m_ref  : (TB, S)        f32 mask (aggregate scaling already folded in)
    # e_ref  : (S, S*M1)      f32 constant mask expander  kron(I_S, 1)
    # w1/w2  : block-diagonal MLP1 weights  (S*D_in,S*H1), (S*H1,S*M1)
    # w20    : (S*M1, H2)     set-sum folded in (vstack of S copies of W20)
    # w21    : (H2, M2)
    # out    : (TB, M2)       f32, unpadded

    # ---- MLP1 (per set element, via block-diagonal weights) ----
    h = jnp.dot(x_ref[...], w1_ref[...],
                preferred_element_type=jnp.float32) + b1_ref[...]
    h = jnp.maximum(h, 0.0)
    z = jnp.dot(h.astype(w2_ref.dtype), w2_ref[...],
                preferred_element_type=jnp.float32) + b2_ref[...]          # (TB, S*M1) f32

    # ---- masked set-aggregation: expand mask on the MXU, reduction folded into w20 ----
    me = jnp.dot(m_ref[...], e_ref[...],
                 preferred_element_type=jnp.float32)                       # (TB, S*M1) f32
    zm = z * me

    # ---- MLP2 (first matmul also performs the sum over the set axis) ----
    h2 = jnp.dot(zm.astype(w20_ref.dtype), w20_ref[...],
                 preferred_element_type=jnp.float32) + b20_ref[...]
    h2 = jnp.maximum(h2, 0.0)
    out_ref[...] = (jnp.dot(h2.astype(w21_ref.dtype), w21_ref[...],
                            preferred_element_type=jnp.float32)
                    + b21_ref[...]).astype(out_ref.dtype)


# ----------------------------------------------------------------------------- #
# Wrapper
# ----------------------------------------------------------------------------- #
def deepsets_forward(x, x_mask, params, aggregate="sum", block_batch=None):
    """x: (B, S, D_in), x_mask: (B, S), params: dict of weights/biases.

    Matmul-input dtype follows x.dtype (pass a bf16 x for the bf16 MXU path); all
    accumulation, bias/relu/masking stays f32.
    """
    B, S, D_in = x.shape
    cdtype = x.dtype
    w10, b10, w11, b11 = params["w10"], params["b10"], params["w11"], params["b11"]
    w20, b20, w21, b21 = params["w20"], params["b20"], params["w21"], params["b21"]
    H1, M1 = w10.shape[1], w11.shape[1]
    H2, M2 = w20.shape[1], w21.shape[1]

    DP, SH1, SM1 = S * D_in, S * H1, S * M1

    # ---- glue: fold MLP1 + set-reduction into lane-dense constant weights (tiny) ----
    eyeS = jnp.eye(S, dtype=jnp.float32)
    w1bd = jnp.kron(eyeS, w10.astype(jnp.float32)).astype(cdtype)      # (S*D_in, S*H1)
    b1t = jnp.tile(b10, S).reshape(1, SH1).astype(jnp.float32)
    w2bd = jnp.kron(eyeS, w11.astype(jnp.float32)).astype(cdtype)      # (S*H1, S*M1)
    b2t = jnp.tile(b11, S).reshape(1, SM1).astype(jnp.float32)
    emask = jnp.kron(eyeS, jnp.ones((1, M1), jnp.float32))             # (S, S*M1)
    w20f = jnp.tile(w20, (S, 1)).astype(cdtype)                        # (S*M1, H2)
    b20r = b20.reshape(1, H2).astype(jnp.float32)
    w21c = w21.astype(cdtype)                                          # (H2, M2)
    b21r = b21.reshape(1, M2).astype(jnp.float32)

    # lane-packed input stream (free row-major reshape, no copy)
    x_packed = x.reshape(B, DP)

    # fold the aggregation scaling into the mask (no extra kernel operand)
    mask = x_mask.astype(jnp.float32)
    if aggregate == "sum":
        m_scaled = mask
    elif aggregate == "mean":
        # torch: mean over dim=1 (divide by S) then divide by sum(mask); guard all-zero rows
        msum = jnp.sum(mask, axis=-1, keepdims=True)
        m_scaled = mask / (S * jnp.where(msum > 0, msum, 1.0))
    else:
        raise ValueError("aggregate must be 'sum' or 'mean'")

    # ---- per-generation VMEM budget (v7x: 64 MiB/TC -> ~48 MiB; v5e/v6e: ~96 MiB) ----
    try:
        phys_vmem = int(getattr(pltpu.get_tpu_info(), "vmem_capacity_bytes", 64 << 20))
    except Exception:
        phys_vmem = 64 << 20
    if phys_vmem < (32 << 20):
        phys_vmem = 64 << 20
    vmem_limit = max(16 << 20, min(phys_vmem * 3 // 4, 100 << 20))

    cb = jnp.dtype(cdtype).itemsize
    weight_bytes = 2 * sum(_vmem_tile_bytes(r, c, b) for (r, c, b) in [
        (DP, SH1, cb), (1, SH1, 4), (SH1, SM1, cb), (1, SM1, 4),
        (S, SM1, 4), (SM1, H2, cb), (1, H2, 4), (H2, M2, cb), (1, M2, 4)])
    # per-batch-row footprint with real (lane-padded) layouts:
    row_bytes = (2 * _round_up(DP, LANE) * cb          # x tile, double-buffered
                 + 2 * _round_up(S, LANE) * 4          # mask tile, double-buffered
                 + 2 * _round_up(M2, LANE) * 4         # out tile, double-buffered
                 + 5 * max(_round_up(SH1, LANE), _round_up(SM1, LANE)) * 4)  # f32 temps
    fixed_bytes = weight_bytes + (2 << 20)             # weights + slack

    TB = (block_batch if block_batch is not None
          else _pick_block_batch(B, row_bytes, fixed_bytes, vmem_limit))
    assert B % TB == 0 and (TB % SUBLANE == 0 or TB == B), "invalid batch tile"
    grid = (B // TB,)

    in_specs = [
        pl.BlockSpec((TB, DP),  lambda i: (i, 0)),   # x tile        (pipelined)
        pl.BlockSpec((TB, S),   lambda i: (i, 0)),   # mask tile     (pipelined)
        pl.BlockSpec((S, SM1),  lambda i: (0, 0)),   # mask expander (resident)
        pl.BlockSpec((DP, SH1), lambda i: (0, 0)),   # w1 block-diag (resident)
        pl.BlockSpec((1, SH1),  lambda i: (0, 0)),   # b1
        pl.BlockSpec((SH1, SM1), lambda i: (0, 0)),  # w2 block-diag
        pl.BlockSpec((1, SM1),  lambda i: (0, 0)),   # b2
        pl.BlockSpec((SM1, H2), lambda i: (0, 0)),   # w20 (set-sum folded)
        pl.BlockSpec((1, H2),   lambda i: (0, 0)),   # b20
        pl.BlockSpec((H2, M2),  lambda i: (0, 0)),   # w21
        pl.BlockSpec((1, M2),   lambda i: (0, 0)),   # b21
    ]
    out_specs = pl.BlockSpec((TB, M2), lambda i: (i, 0))   # unpadded output block

    out = pl.pallas_call(
        _deepsets_kernel,
        out_shape=jax.ShapeDtypeStruct((B, M2), jnp.float32),
        grid=grid,
        in_specs=in_specs,
        out_specs=out_specs,
        compiler_params=pltpu.CompilerParams(
            dimension_semantics=("parallel",),       # batch tiles shard across TCs (v7x)
            vmem_limit_bytes=int(vmem_limit)),
    )(x_packed, m_scaled, emask,
      w1bd, b1t, w2bd, b2t, w20f, b20r, w21c, b21r)
    return out


# ----------------------------------------------------------------------------- #
# Deterministic parameter init (xavier_normal weights, zero biases), like the module
# ----------------------------------------------------------------------------- #
def make_params(key, input_size, mlp1_layers, mlp1_output_size,
                mlp2_layers, mlp2_output_size):
    def xavier(k, fan_in, fan_out):
        std = (2.0 / (fan_in + fan_out)) ** 0.5
        return std * jax.random.normal(k, (fan_in, fan_out), dtype=jnp.float32)

    (h1,) = mlp1_layers
    (h2,) = mlp2_layers
    k = jax.random.split(key, 4)
    return {
        "w10": xavier(k[0], input_size, h1),       "b10": jnp.zeros((h1,), jnp.float32),
        "w11": xavier(k[1], h1, mlp1_output_size), "b11": jnp.zeros((mlp1_output_size,), jnp.float32),
        "w20": xavier(k[2], mlp1_output_size, h2), "b20": jnp.zeros((h2,), jnp.float32),
        "w21": xavier(k[3], h2, mlp2_output_size), "b21": jnp.zeros((mlp2_output_size,), jnp.float32),
    }


def deepsets_reference(x, x_mask, p, aggregate="sum"):
    """Pure-JAX reference mirroring the PyTorch forward exactly."""
    h = jnp.maximum(x @ p["w10"] + p["b10"], 0.0)
    z = h @ p["w11"] + p["b11"]                      # MLP.forward returns pre-activation
    z = z * x_mask[..., None]
    if aggregate == "sum":
        agg = jnp.sum(z, axis=1)
    else:
        agg = jnp.mean(z, axis=1) / jnp.sum(x_mask, axis=-1, keepdims=True)
    h2 = jnp.maximum(agg @ p["w20"] + p["b20"], 0.0)
    return h2 @ p["w21"] + p["b21"]


if __name__ == "__main__":
    input_size, mlp1_output_size, mlp2_output_size = 16, 32, 16
    mlp1_layers, mlp2_layers = [32], [32]
    S = 8

    key = jax.random.PRNGKey(0)
    kx, km, kp = jax.random.split(key, 3)
    params = make_params(kp, input_size, mlp1_layers, mlp1_output_size,
                         mlp2_layers, mlp2_output_size)

    # --- small shape (B=2): both aggregation modes, f32 ---
    B = 2
    x = jax.random.normal(kx, (B, S, input_size), dtype=jnp.float32)
    x_mask = (jax.random.uniform(km, (B, S)) > 0.3).astype(jnp.float32)
    x_mask = x_mask.at[:, 0].set(1.0)   # avoid all-zero rows for the 'mean' comparison

    for agg in ("sum", "mean"):
        out = jax.block_until_ready(deepsets_forward(x, x_mask, params, aggregate=agg))
        ref = deepsets_reference(x, x_mask, params, aggregate=agg)
        assert out.shape == (B, mlp2_output_size)
        assert jnp.allclose(out, ref, atol=1e-3, rtol=1e-3), f"mismatch ({agg}, f32)"

    # --- multi-tile grid (B=64, TB=16): exercises the pipelined batch tiling ---
    B2 = 64
    kx2, km2 = jax.random.split(jax.random.PRNGKey(1), 2)
    x2 = jax.random.normal(kx2, (B2, S, input_size), dtype=jnp.float32)
    m2 = (jax.random.uniform(km2, (B2, S)) > 0.3).astype(jnp.float32)
    m2 = m2.at[:, 0].set(1.0)
    out2 = jax.block_until_ready(
        deepsets_forward(x2, m2, params, aggregate="sum", block_batch=16))
    ref2 = deepsets_reference(x2, m2, params, aggregate="sum")
    assert jnp.allclose(out2, ref2, atol=1e-3, rtol=1e-3), "mismatch (sum, f32, multi-tile)"

    # --- bf16 path (x already bf16 -> bf16 MXU inputs, f32 accumulation), loose tol ---
    out_bf16 = jax.block_until_ready(
        deepsets_forward(x.astype(jnp.bfloat16), x_mask, params, aggregate="sum"))
    ref = deepsets_reference(x, x_mask, params, aggregate="sum")
    assert jnp.allclose(out_bf16, ref, atol=2e-1, rtol=2e-1), "mismatch (sum, bf16)"

    print("KERNEL_OK")
</pallas_src>

<mosaic_0001>
module attributes {stable_mosaic.version = 11 : i64} {
  func.func @_deepsets_kernel(%arg0: i32, %arg1: memref<2x128xf32, #tpu.memory_space<vmem>>, %arg2: memref<2x8xf32, #tpu.memory_space<vmem>>, %arg3: memref<8x256xf32, #tpu.memory_space<vmem>>, %arg4: memref<128x256xf32, #tpu.memory_space<vmem>>, %arg5: memref<1x256xf32, #tpu.memory_space<vmem>>, %arg6: memref<256x256xf32, #tpu.memory_space<vmem>>, %arg7: memref<1x256xf32, #tpu.memory_space<vmem>>, %arg8: memref<256x32xf32, #tpu.memory_space<vmem>>, %arg9: memref<1x32xf32, #tpu.memory_space<vmem>>, %arg10: memref<32x16xf32, #tpu.memory_space<vmem>>, %arg11: memref<1x16xf32, #tpu.memory_space<vmem>>, %arg12: memref<2x16xf32, #tpu.memory_space<vmem>>) attributes {dimension_semantics = [#tpu.dimension_semantics<parallel>], iteration_bounds = array<i64: 1>, scalar_prefetch = 0 : i64, scratch_operands = 0 : i64, tpu.core_type = #tpu.core_type<tc>, window_params = [{transform_indices = @transform_0, window_bounds = array<i64: 2, 128>}, {transform_indices = @transform_1, window_bounds = array<i64: 2, 8>}, {pipeline_mode = #tpu.pipeline_mode<synchronous>, transform_indices = @transform_2, window_bounds = array<i64: 8, 256>}, {pipeline_mode = #tpu.pipeline_mode<synchronous>, transform_indices = @transform_3, window_bounds = array<i64: 128, 256>}, {pipeline_mode = #tpu.pipeline_mode<synchronous>, transform_indices = @transform_4, window_bounds = array<i64: 1, 256>}, {pipeline_mode = #tpu.pipeline_mode<synchronous>, transform_indices = @transform_5, window_bounds = array<i64: 256, 256>}, {pipeline_mode = #tpu.pipeline_mode<synchronous>, transform_indices = @transform_6, window_bounds = array<i64: 1, 256>}, {pipeline_mode = #tpu.pipeline_mode<synchronous>, transform_indices = @transform_7, window_bounds = array<i64: 256, 32>}, {pipeline_mode = #tpu.pipeline_mode<synchronous>, transform_indices = @transform_8, window_bounds = array<i64: 1, 32>}, {pipeline_mode = #tpu.pipeline_mode<synchronous>, transform_indices = @transform_9, window_bounds = array<i64: 32, 16>}, {pipeline_mode = #tpu.pipeline_mode<synchronous>, transform_indices = @transform_10, window_bounds = array<i64: 1, 16>}, {transform_indices = @transform_11, window_bounds = array<i64: 2, 16>}]} {
    %c0 = arith.constant 0 : index
    %c0_0 = arith.constant 0 : index
    %0 = vector.load %arg1[%c0, %c0_0] : memref<2x128xf32, #tpu.memory_space<vmem>>, vector<2x128xf32>
    %c0_1 = arith.constant 0 : index
    %c0_2 = arith.constant 0 : index
    %1 = vector.load %arg4[%c0_1, %c0_2] : memref<128x256xf32, #tpu.memory_space<vmem>>, vector<128x256xf32>
    %cst = arith.constant dense<0.000000e+00> : vector<2x256xf32>
    %2 = tpu.matmul %0, %1, %cst {dimension_numbers = #tpu.dot_dimension_numbers<[1], [0], [0], [1], [0, 0, 1, 1], [], []>} : vector<2x128xf32>, vector<128x256xf32>, vector<2x256xf32> -> vector<2x256xf32>
    %c0_3 = arith.constant 0 : index
    %c0_4 = arith.constant 0 : index
    %3 = vector.load %arg5[%c0_3, %c0_4] : memref<1x256xf32, #tpu.memory_space<vmem>>, vector<1x256xf32>
    %4 = vector.broadcast %3 : vector<1x256xf32> to vector<2x256xf32>
    %5 = arith.addf %2, %4 : vector<2x256xf32>
    %cst_5 = arith.constant 0.000000e+00 : f32
    %6 = vector.broadcast %cst_5 : f32 to vector<2x256xf32>
    %7 = arith.maximumf %5, %6 : vector<2x256xf32>
    %c0_6 = arith.constant 0 : index
    %c0_7 = arith.constant 0 : index
    %8 = vector.load %arg6[%c0_6, %c0_7] : memref<256x256xf32, #tpu.memory_space<vmem>>, vector<256x256xf32>
    %cst_8 = arith.constant dense<0.000000e+00> : vector<2x256xf32>
    %9 = tpu.matmul %7, %8, %cst_8 {dimension_numbers = #tpu.dot_dimension_numbers<[1], [0], [0], [1], [0, 0, 1, 1], [], []>} : vector<2x256xf32>, vector<256x256xf32>, vector<2x256xf32> -> vector<2x256xf32>
    %c0_9 = arith.constant 0 : index
    %c0_10 = arith.constant 0 : index
    %10 = vector.load %arg7[%c0_9, %c0_10] : memref<1x256xf32, #tpu.memory_space<vmem>>, vector<1x256xf32>
    %11 = vector.broadcast %10 : vector<1x256xf32> to vector<2x256xf32>
    %12 = arith.addf %9, %11 : vector<2x256xf32>
    %c0_11 = arith.constant 0 : index
    %c0_12 = arith.constant 0 : index
    %13 = vector.load %arg2[%c0_11, %c0_12] : memref<2x8xf32, #tpu.memory_space<vmem>>, vector<2x8xf32>
    %c0_13 = arith.constant 0 : index
    %c0_14 = arith.constant 0 : index
    %14 = vector.load %arg3[%c0_13, %c0_14] : memref<8x256xf32, #tpu.memory_space<vmem>>, vector<8x256xf32>
    %cst_15 = arith.constant dense<0.000000e+00> : vector<2x256xf32>
    %15 = tpu.matmul %13, %14, %cst_15 {dimension_numbers = #tpu.dot_dimension_numbers<[1], [0], [0], [1], [0, 0, 1, 1], [], []>} : vector<2x8xf32>, vector<8x256xf32>, vector<2x256xf32> -> vector<2x256xf32>
    %16 = arith.mulf %12, %15 : vector<2x256xf32>
    %c0_16 = arith.constant 0 : index
    %c0_17 = arith.constant 0 : index
    %17 = vector.load %arg8[%c0_16, %c0_17] : memref<256x32xf32, #tpu.memory_space<vmem>>, vector<256x32xf32>
    %cst_18 = arith.constant dense<0.000000e+00> : vector<2x32xf32>
    %18 = tpu.matmul %16, %17, %cst_18 {dimension_numbers = #tpu.dot_dimension_numbers<[1], [0], [0], [1], [0, 0, 1, 1], [], []>} : vector<2x256xf32>, vector<256x32xf32>, vector<2x32xf32> -> vector<2x32xf32>
    %c0_19 = arith.constant 0 : index
    %c0_20 = arith.constant 0 : index
    %19 = vector.load %arg9[%c0_19, %c0_20] : memref<1x32xf32, #tpu.memory_space<vmem>>, vector<1x32xf32>
    %20 = vector.broadcast %19 : vector<1x32xf32> to vector<2x32xf32>
    %21 = arith.addf %18, %20 : vector<2x32xf32>
    %cst_21 = arith.constant 0.000000e+00 : f32
    %22 = vector.broadcast %cst_21 : f32 to vector<2x32xf32>
    %23 = arith.maximumf %21, %22 : vector<2x32xf32>
    %c0_22 = arith.constant 0 : index
    %c0_23 = arith.constant 0 : index
    %24 = vector.load %arg10[%c0_22, %c0_23] : memref<32x16xf32, #tpu.memory_space<vmem>>, vector<32x16xf32>
    %cst_24 = arith.constant dense<0.000000e+00> : vector<2x16xf32>
    %25 = tpu.matmul %23, %24, %cst_24 {dimension_numbers = #tpu.dot_dimension_numbers<[1], [0], [0], [1], [0, 0, 1, 1], [], []>} : vector<2x32xf32>, vector<32x16xf32>, vector<2x16xf32> -> vector<2x16xf32>
    %c0_25 = arith.constant 0 : index
    %c0_26 = arith.constant 0 : index
    %26 = vector.load %arg11[%c0_25, %c0_26] : memref<1x16xf32, #tpu.memory_space<vmem>>, vector<1x16xf32>
    %27 = vector.broadcast %26 : vector<1x16xf32> to vector<2x16xf32>
    %28 = arith.addf %25, %27 : vector<2x16xf32>
    %c0_27 = arith.constant 0 : index
    %c0_28 = arith.constant 0 : index
    %29 = vector.load %arg12[%c0_27, %c0_28] : memref<2x16xf32, #tpu.memory_space<vmem>>, vector<2x16xf32>
    tpu.vector_store %arg12[%c0_27, %c0_28], %28 {strides = array<i32>} : memref<2x16xf32, #tpu.memory_space<vmem>>, vector<2x16xf32>,
    return
  }
  func.func @transform_0(%arg0: i32) -> (i32, i32) {
    %c0_i32 = arith.constant 0 : i32
    %c0_i32_0 = arith.constant 0 : i32
    return %arg0, %c0_i32 : i32, i32
  }
  func.func @transform_1(%arg0: i32) -> (i32, i32) {
    %c0_i32 = arith.constant 0 : i32
    %c0_i32_0 = arith.constant 0 : i32
    return %arg0, %c0_i32 : i32, i32
  }
  func.func @transform_2(%arg0: i32) -> (i32, i32) {
    %c0_i32 = arith.constant 0 : i32
    %c0_i32_0 = arith.constant 0 : i32
    %c0_i32_1 = arith.constant 0 : i32
    return %c0_i32, %c0_i32_0 : i32, i32
  }
  func.func @transform_3(%arg0: i32) -> (i32, i32) {
    %c0_i32 = arith.constant 0 : i32
    %c0_i32_0 = arith.constant 0 : i32
    %c0_i32_1 = arith.constant 0 : i32
    return %c0_i32, %c0_i32_0 : i32, i32
  }
  func.func @transform_4(%arg0: i32) -> (i32, i32) {
    %c0_i32 = arith.constant 0 : i32
    %c0_i32_0 = arith.constant 0 : i32
    %c0_i32_1 = arith.constant 0 : i32
    return %c0_i32, %c0_i32_0 : i32, i32
  }
  func.func @transform_5(%arg0: i32) -> (i32, i32) {
    %c0_i32 = arith.constant 0 : i32
    %c0_i32_0 = arith.constant 0 : i32
    %c0_i32_1 = arith.constant 0 : i32
    return %c0_i32, %c0_i32_0 : i32, i32
  }
  func.func @transform_6(%arg0: i32) -> (i32, i32) {
    %c0_i32 = arith.constant 0 : i32
    %c0_i32_0 = arith.constant 0 : i32
    %c0_i32_1 = arith.constant 0 : i32
    return %c0_i32, %c0_i32_0 : i32, i32
  }
  func.func @transform_7(%arg0: i32) -> (i32, i32) {
    %c0_i32 = arith.constant 0 : i32
    %c0_i32_0 = arith.constant 0 : i32
    %c0_i32_1 = arith.constant 0 : i32
    return %c0_i32, %c0_i32_0 : i32, i32
  }
  func.func @transform_8(%arg0: i32) -> (i32, i32) {
    %c0_i32 = arith.constant 0 : i32
    %c0_i32_0 = arith.constant 0 : i32
    %c0_i32_1 = arith.constant 0 : i32
    return %c0_i32, %c0_i32_0 : i32, i32
  }
  func.func @transform_9(%arg0: i32) -> (i32, i32) {
    %c0_i32 = arith.constant 0 : i32
    %c0_i32_0 = arith.constant 0 : i32
    %c0_i32_1 = arith.constant 0 : i32
    return %c0_i32, %c0_i32_0 : i32, i32
  }
  func.func @transform_10(%arg0: i32) -> (i32, i32) {
    %c0_i32 = arith.constant 0 : i32
    %c0_i32_0 = arith.constant 0 : i32
    %c0_i32_1 = arith.constant 0 : i32
    return %c0_i32, %c0_i32_0 : i32, i32
  }
  func.func @transform_11(%arg0: i32) -> (i32, i32) {
    %c0_i32 = arith.constant 0 : i32
    %c0_i32_0 = arith.constant 0 : i32
    return %arg0, %c0_i32 : i32, i32
  }
}

</mosaic_0001>

<bundles_post_ra>
// kernel: tpu_custom_call.1
= control target key start
LH: loop header
LB: loop body
LE: loop exit
PB: predicated region body
PF: predicated region fallthrough
CT: control target
= control target key end

     0   :  { %16 = vsyncpa [#allocation3], 0  ;;  %s822_s0 = inlined_call_operand.vmem [shape: f32[2,128], index: 0, kind: input, shape index: {}]   ;;  %s823_s1 = inlined_call_operand.vmem [shape: f32[2,8], index: 1, kind: input, shape index: {}]   ;;  %s824_s2 = inlined_call_operand.vmem [shape: f32[8,256], index: 2, kind: input, shape index: {}]   ;;  %s825_s3 = inlined_call_operand.vmem [shape: f32[128,256], index: 3, kind: input, shape index: {}]   ;;  %s826_s4 = inlined_call_operand.vmem [shape: f32[1,256], index: 4, kind: input, shape index: {}]   ;;  %s827_s5 = inlined_call_operand.hbm [shape: f32[256,256], index: 5, kind: input, shape index: {}]   ;;  %s828_s6 = inlined_call_operand.vmem [shape: f32[1,256], index: 6, kind: input, shape index: {}]   ;;  %s829_s7 = inlined_call_operand.vmem [shape: f32[256,32], index: 7, kind: input, shape index: {}]   ;;  %s830_s8 = inlined_call_operand.vmem [shape: f32[1,32], index: 8, kind: input, shape index: {}]   ;;  %s831_s9 = inlined_call_operand.vmem [shape: f32[32,16], index: 9, kind: input, shape index: {}]   ;;  %s832_s10 = inlined_call_operand.vmem [shape: f32[1,16], index: 10, kind: input, shape index: {}]   ;;  %s833_s11 = inlined_call_operand.hbm [shape: f32[2,16], index: 11, kind: output, shape index: {}]  }
   0x1   :  { %17 = vsyncpa [#allocation4], 0  ;;  %s32_s19 = sshll.u32 %s827_s5, 4  ;;  %s524_s20 = smov [#allocation2]   ;;  %s33_s19 = int_to_ptr.hbm [resolvable:$true] %s32_s19 }
   0x2   :  { %s34_s21 = sshll.u32 %s524_s20, 4  ;;  %s525_s22 = smov 256   ;;  %s35_s21 = int_to_ptr.vmem [resolvable:$true] %s34_s21 }
   0x3   :  { %s526_s23 = smov 16  }
   0x4   :  { %40 = dma.hbm_to_vmem [thread:$0]  %s33_s19, 8192, %s35_s21, [#allocation3], %s525_s22, %s525_s22, %s526_s23  }
   0x5   :  { %520 = dma.done.wait [#allocation3], 8192  }
   0x6   :  { %521 = vsyncadd [#allocation3], 4294959104  ;;  %v86_v0 = vld [vmem:[%s825_s3 + $0xf0] sm:$0xff]  ;;  %v87_v1 = vld [vmem:[%s825_s3 + $0xf8] sm:$0xff]  ;;  %vm289_vm0 = vcmask 64512   ;;  %vm420_vm1 = vcmask 261120  }
   0x7   :  { %v84_v2 = vld [vmem:[%s825_s3 + $0xe0] sm:$0xff]  ;;  %94 = vmatpush.msra.mxu0 %v86_v0  ;;  %114 = vmatpush.msra.mxu1 %v87_v1  ;;  %v85_v3 = vld [vmem:[%s825_s3 + $0xe8] sm:$0xff]  ;;  %v82_v4 = vld [vmem:[%s825_s3 + $0xd0] sm:$0xff]  ;;  %s527_s16 = smov [#allocation5]   ;;  %s453_s18 = sshll.u32 %s833_s11, 4  ;;  %vm444_vm2 = vcmask 123904   ;;  %s454_s18 = int_to_ptr.hbm [resolvable:$true] %s453_s18 }
   0x8   :  { %v83_v5 = vld [vmem:[%s825_s3 + $0xd8] sm:$0xff]  ;;  %v80_v6 = vld [vmem:[%s825_s3 + $0xc0] sm:$0xff]  ;;  %v81_v7 = vld [vmem:[%s825_s3 + $0xc8] sm:$0xff] }
   0x9   :  { %95 = vmatpush.msra.mxu0 %v84_v2  ;;  %115 = vmatpush.msra.mxu1 %v85_v3  ;;  %v78_v8 = vld [vmem:[%s825_s3 + $0xb0] sm:$0xff]  ;;  %v79_v9 = vld [vmem:[%s825_s3 + $0xb8] sm:$0xff]  ;;  %v76_v10 = vld [vmem:[%s825_s3 + $0xa0] sm:$0xff] }
   0xa   :  { %v77_v11 = vld [vmem:[%s825_s3 + $0xa8] sm:$0xff]  ;;  %v74_v12 = vld [vmem:[%s825_s3 + $0x90] sm:$0xff]  ;;  %v75_v13 = vld [vmem:[%s825_s3 + $0x98] sm:$0xff] }
   0xb   :  { %96 = vmatpush.msra.mxu0 %v82_v4  ;;  %116 = vmatpush.msra.mxu1 %v83_v5  ;;  %v72_v14 = vld [vmem:[%s825_s3 + $0x80] sm:$0xff]  ;;  %v166_v15 = vld [vmem:[#allocation2 + $0xf0] sm:$0xff]  ;;  %v73_v17 = vld [vmem:[%s825_s3 + $0x88] sm:$0xff] }
   0xc   :  { %v198_v16 = vld [vmem:[#allocation2 + $0x1f0] sm:$0xff]  ;;  %206 = vmatpush.msra.mxu2 %v166_v15  ;;  %v164_v18 = vld [vmem:[#allocation2 + $0xe0] sm:$0xff]  ;;  %v71_v23 = vld [vmem:[%s825_s3 + $0x78] sm:$0xff] }
   0xd   :  { %97 = vmatpush.msra.mxu0 %v80_v6  ;;  %117 = vmatpush.msra.mxu1 %v81_v7  ;;  %v196_v19 = vld [vmem:[#allocation2 + $0x1e0] sm:$0xff]  ;;  %v162_v20 = vld [vmem:[#allocation2 + $0xd0] sm:$0xff]  ;;  %v69_v27 = vld [vmem:[%s825_s3 + $0x68] sm:$0xff] }
   0xe   :  { %226 = vmatpush.msra.mxu3 %v198_v16  ;;  %v194_v21 = vld [vmem:[#allocation2 + $0x1d0] sm:$0xff]  ;;  %207 = vmatpush.msra.mxu2 %v164_v18  ;;  %v160_v24 = vld [vmem:[#allocation2 + $0xc0] sm:$0xff]  ;;  %v67_v31 = vld [vmem:[%s825_s3 + $0x58] sm:$0xff] }
   0xf   :  { %98 = vmatpush.msra.mxu0 %v78_v8  ;;  %118 = vmatpush.msra.mxu1 %v79_v9  ;;  %v70_v22 = vld [vmem:[%s825_s3 + $0x70] sm:$0xff]  ;;  %v192_v25 = vld [vmem:[#allocation2 + $0x1c0] sm:$0xff]  ;;  %v65_v35 = vld [vmem:[%s825_s3 + $0x48] sm:$0xff] }
  0x10   :  { %227 = vmatpush.msra.mxu3 %v196_v19  ;;  %v68_v26 = vld [vmem:[%s825_s3 + $0x60] sm:$0xff]  ;;  %208 = vmatpush.msra.mxu2 %v162_v20  ;;  %v158_v28 = vld [vmem:[#allocation2 + $0xb0] sm:$0xff]  ;;  %v63_v39 = vld [vmem:[%s825_s3 + $0x38] sm:$0xff] }
  0x11   :  { %99 = vmatpush.msra.mxu0 %v76_v10  ;;  %119 = vmatpush.msra.mxu1 %v77_v11  ;;  %v190_v29 = vld [vmem:[#allocation2 + $0x1b0] sm:$0xff]  ;;  %v156_v32 = vld [vmem:[#allocation2 + $0xa0] sm:$0xff]  ;;  %v61_v43 = vld [vmem:[%s825_s3 + $0x28] sm:$0xff] }
  0x12   :  { %228 = vmatpush.msra.mxu3 %v194_v21  ;;  %v66_v30 = vld [vmem:[%s825_s3 + $0x50] sm:$0xff]  ;;  %209 = vmatpush.msra.mxu2 %v160_v24  ;;  %v188_v33 = vld [vmem:[#allocation2 + $0x1a0] sm:$0xff]  ;;  %v59_v47 = vld [vmem:[%s825_s3 + $0x18] sm:$0xff] }
  0x13   :  { %100 = vmatpush.msra.mxu0 %v74_v12  ;;  %120 = vmatpush.msra.mxu1 %v75_v13  ;;  %v64_v34 = vld [vmem:[%s825_s3 + $0x40] sm:$0xff]  ;;  %v154_v36 = vld [vmem:[#allocation2 + $0x90] sm:$0xff]  ;;  %v57_v51 = vld [vmem:[%s825_s3 + $0x8] sm:$0xff] }
  0x14   :  { %229 = vmatpush.msra.mxu3 %v192_v25  ;;  %210 = vmatpush.msra.mxu2 %v158_v28  ;;  %v186_v37 = vld [vmem:[#allocation2 + $0x190] sm:$0xff]  ;;  %v152_v40 = vld [vmem:[#allocation2 + $0x80] sm:$0xff]  ;;  %v167_v53 = vld [vmem:[#allocation2 + $0xf8] sm:$0xff] }
  0x15   :  { %101 = vmatpush.msra.mxu0 %v72_v14  ;;  %121 = vmatpush.msra.mxu1 %v73_v17  ;;  %v62_v38 = vld [vmem:[%s825_s3 + $0x30] sm:$0xff]  ;;  %v184_v41 = vld [vmem:[#allocation2 + $0x180] sm:$0xff]  ;;  %v199_v54 = vld [vmem:[#allocation2 + $0x1f8] sm:$0xff] }
  0x16   :  { %230 = vmatpush.msra.mxu3 %v190_v29  ;;  %211 = vmatpush.msra.mxu2 %v156_v32  ;;  %v60_v42 = vld [vmem:[%s825_s3 + $0x20] sm:$0xff]  ;;  %v150_v44 = vld [vmem:[#allocation2 + $0x70] sm:$0xff]  ;;  %v165_v57 = vld [vmem:[#allocation2 + $0xe8] sm:$0xff] }
  0x17   :  { %102 = vmatpush.msra.mxu0 %v70_v22  ;;  %122 = vmatpush.msra.mxu1 %v71_v23  ;;  %v182_v45 = vld [vmem:[#allocation2 + $0x170] sm:$0xff]  ;;  %v56_v48 = vld [vmem:[%s825_s3] sm:$0xff]  ;;  %v197_v58 = vld [vmem:[#allocation2 + $0x1e8] sm:$0xff] }
  0x18   :  { %231 = vmatpush.msra.mxu3 %v188_v33  ;;  %212 = vmatpush.msra.mxu2 %v154_v36  ;;  %v58_v46 = vld [vmem:[%s825_s3 + $0x10] sm:$0xff]  ;;  %v148_v49 = vld [vmem:[#allocation2 + $0x60] sm:$0xff]  ;;  %v163_v61 = vld [vmem:[#allocation2 + $0xd8] sm:$0xff] }
  0x19   :  { %103 = vmatpush.msra.mxu0 %v68_v26  ;;  %123 = vmatpush.msra.mxu1 %v69_v27  ;;  %v180_v50 = vld [vmem:[#allocation2 + $0x160] sm:$0xff]  ;;  %v146_v55 = vld [vmem:[#allocation2 + $0x50] sm:$0xff]  ;;  %v195_v62 = vld [vmem:[#allocation2 + $0x1d8] sm:$0xff] }
  0x1a   :  { %232 = vmatpush.msra.mxu3 %v186_v37  ;;  %213 = vmatpush.msra.mxu2 %v152_v40  ;;  %v55_v52 = vld [vmem:[%s822_s0] sm:$0x3]  ;;  %v178_v56 = vld [vmem:[#allocation2 + $0x150] sm:$0xff]  ;;  %v161_v1 = vld [vmem:[#allocation2 + $0xc8] sm:$0xff] }
  0x1b   :  { %104 = vmatpush.msra.mxu0 %v66_v30  ;;  %124 = vmatpush.msra.mxu1 %v67_v31  ;;  %v144_v59 = vld [vmem:[#allocation2 + $0x40] sm:$0xff]  ;;  %v142_v63 = vld [vmem:[#allocation2 + $0x30] sm:$0xff]  ;;  %v193_v2 = vld [vmem:[#allocation2 + $0x1c8] sm:$0xff] }
  0x1c   :  { %233 = vmatpush.msra.mxu3 %v184_v41  ;;  %214 = vmatpush.msra.mxu2 %v150_v44  ;;  %v176_v60 = vld [vmem:[#allocation2 + $0x140] sm:$0xff]  ;;  %v174_v0 = vld [vmem:[#allocation2 + $0x130] sm:$0xff]  ;;  %v159_v3 = vld [vmem:[#allocation2 + $0xb8] sm:$0xff] }
  0x1d   :  { %105 = vmatpush.msra.mxu0 %v64_v34  ;;  %125 = vmatpush.msra.mxu1 %v65_v35  ;;  %v191_v4 = vld [vmem:[#allocation2 + $0x1b8] sm:$0xff]  ;;  %v157_v5 = vld [vmem:[#allocation2 + $0xa8] sm:$0xff]  ;;  %v140_v20 = vld [vmem:[#allocation2 + $0x20] sm:$0xff] }
  0x1e   :  { %234 = vmatpush.msra.mxu3 %v182_v45  ;;  %215 = vmatpush.msra.mxu2 %v148_v49  ;;  %v189_v6 = vld [vmem:[#allocation2 + $0x1a8] sm:$0xff]  ;;  %v155_v7 = vld [vmem:[#allocation2 + $0x98] sm:$0xff]  ;;  %v172_v21 = vld [vmem:[#allocation2 + $0x120] sm:$0xff] }
  0x1f   :  { %106 = vmatpush.msra.mxu0 %v62_v38  ;;  %126 = vmatpush.msra.mxu1 %v63_v39  ;;  %v187_v8 = vld [vmem:[#allocation2 + $0x198] sm:$0xff]  ;;  %v153_v9 = vld [vmem:[#allocation2 + $0x88] sm:$0xff]  ;;  %v138_v24 = vld [vmem:[#allocation2 + $0x10] sm:$0xff] }
  0x20   :  { %235 = vmatpush.msra.mxu3 %v180_v50  ;;  %216 = vmatpush.msra.mxu2 %v146_v55  ;;  %v185_v10 = vld [vmem:[#allocation2 + $0x188] sm:$0xff]  ;;  %v151_v11 = vld [vmem:[#allocation2 + $0x78] sm:$0xff]  ;;  %v170_v25 = vld [vmem:[#allocation2 + $0x110] sm:$0xff] }
  0x21   :  { %107 = vmatpush.msra.mxu0 %v60_v42  ;;  %127 = vmatpush.msra.mxu1 %v61_v43  ;;  %v183_v12 = vld [vmem:[#allocation2 + $0x178] sm:$0xff]  ;;  %v149_v13 = vld [vmem:[#allocation2 + $0x68] sm:$0xff]  ;;  %v136_v28 = vld [vmem:[#allocation2] sm:$0xff] }
  0x22   :  { %236 = vmatpush.msra.mxu3 %v178_v56  ;;  %217 = vmatpush.msra.mxu2 %v144_v59  ;;  %v181_v14 = vld [vmem:[#allocation2 + $0x168] sm:$0xff]  ;;  %v147_v15 = vld [vmem:[#allocation2 + $0x58] sm:$0xff]  ;;  %v168_v29 = vld [vmem:[#allocation2 + $0x100] sm:$0xff] }
  0x23   :  { %108 = vmatpush.msra.mxu0 %v58_v46  ;;  %128 = vmatpush.msra.mxu1 %v59_v47  ;;  %v179_v16 = vld [vmem:[#allocation2 + $0x158] sm:$0xff]  ;;  %v145_v17 = vld [vmem:[#allocation2 + $0x48] sm:$0xff]  ;;  %v287_v32 = vld [vmem:[%s824_s2] sm:$0xff] }
  0x24   :  { %237 = vmatpush.msra.mxu3 %v176_v60  ;;  %218 = vmatpush.msra.mxu2 %v142_v63  ;;  %v177_v18 = vld [vmem:[#allocation2 + $0x148] sm:$0xff]  ;;  %v143_v19 = vld [vmem:[#allocation2 + $0x38] sm:$0xff]  ;;  %v88_v35 = vld [vmem:[%s826_s4] sm:$0x3]  ;;  %s451_s4 = sshll.u32 %s527_s16, 4  ;;  %s452_s4 = int_to_ptr.vmem [resolvable:$true] %s451_s4 }
  0x25   :  { %109 = vmatpush.msra.mxu0 %v56_v48  ;;  %129 = vmatpush.msra.mxu1 %v57_v51  ;;  %v141_v22 = vld [vmem:[#allocation2 + $0x28] sm:$0xff]  ;;  %v175_v23 = vld [vmem:[#allocation2 + $0x138] sm:$0xff]  ;;  %v90_v36 = vperm.slane %v88_v35, 0  ;;  %v91_v37 = vperm.slane %v88_v35, 1  ;;  %v349_v46 = vld [vmem:[%s829_s7 + $0x70] sm:$0xff] }
  0x26   :  { %110 = vmatmul.f32.vlgmr.msra.gmra.mxu0 %v55_v52  ;;  %130 = vmatmul.f32.vlgmr.msra.gmra.mxu1 %v55_v52  ;;  %v139_v26 = vld [vmem:[#allocation2 + $0x18] sm:$0xff]  ;;  %v173_v27 = vld [vmem:[#allocation2 + $0x128] sm:$0xff]  ;;  %v365_v47 = vld [vmem:[%s829_s7 + $0xf0] sm:$0xff] }
  0x27   :  { %246 = vmatpush.msrb.mxu0 %v167_v53  ;;  %266 = vmatpush.msrb.mxu1 %v199_v54  ;;  %v137_v30 = vld [vmem:[#allocation2 + $0x8] sm:$0xff]  ;;  %v171_v31 = vld [vmem:[#allocation2 + $0x118] sm:$0xff]  ;;  %v286_v50 = vld [vmem:[%s823_s1] sm:$0x3] }
  0x28   :  { %238 = vmatpush.msra.mxu3 %v174_v0  ;;  %219 = vmatpush.msra.mxu2 %v140_v20  ;;  %v169_v33 = vld [vmem:[#allocation2 + $0x108] sm:$0xff]  ;;  %v350_v44 = vld [vmem:[%s829_s7 + $0x78] sm:$0xff]  ;;  %v347_v51 = vld [vmem:[%s829_s7 + $0x60] sm:$0xff] }
  0x29   :  { %247 = vmatpush.msrb.mxu0 %v165_v57  ;;  %267 = vmatpush.msrb.mxu1 %v197_v58  ;;  %v288_v34 = vld [vmem:[%s824_s2 + $0x8] sm:$0xff]  ;;  %v366_v45 = vld [vmem:[%s829_s7 + $0xf8] sm:$0xff]  ;;  %v363_v52 = vld [vmem:[%s829_s7 + $0xe0] sm:$0xff] }
  0x2a   :  { %239 = vmatpush.msra.mxu3 %v172_v21  ;;  %220 = vmatpush.msra.mxu2 %v138_v24  ;;  %v348_v48 = vld [vmem:[%s829_s7 + $0x68] sm:$0xff]  ;;  %v346_v53 = vld [vmem:[%s829_s7 + $0x58] sm:$0xff]  ;;  %v345_v55 = vld [vmem:[%s829_s7 + $0x50] sm:$0xff] }
  0x2b   :  { %248 = vmatpush.msrb.mxu0 %v163_v61  ;;  %268 = vmatpush.msrb.mxu1 %v195_v62  ;;  %v364_v49 = vld [vmem:[%s829_s7 + $0xe8] sm:$0xff]  ;;  %v362_v54 = vld [vmem:[%s829_s7 + $0xd8] sm:$0xff]  ;;  %v361_v56 = vld [vmem:[%s829_s7 + $0xd0] sm:$0xff] }
  0x2c   :  { %240 = vmatpush.msra.mxu3 %v170_v25  ;;  %221 = vmatpush.msra.mxu2 %v136_v28  ;;  %v344_v57 = vld [vmem:[%s829_s7 + $0x48] sm:$0xff]  ;;  %v343_v59 = vld [vmem:[%s829_s7 + $0x40] sm:$0xff]  ;;  %v342_v61 = vld [vmem:[%s829_s7 + $0x38] sm:$0xff] }
  0x2d   :  { %249 = vmatpush.msrb.mxu0 %v161_v1  ;;  %269 = vmatpush.msrb.mxu1 %v193_v2  ;;  %v360_v58 = vld [vmem:[%s829_s7 + $0xc8] sm:$0xff]  ;;  %v359_v60 = vld [vmem:[%s829_s7 + $0xc0] sm:$0xff]  ;;  %v358_v62 = vld [vmem:[%s829_s7 + $0xb8] sm:$0xff] }
  0x2e   :  { %241 = vmatpush.msra.mxu3 %v168_v29  ;;  %308 = vmatpush.msrb.mxu2 %v287_v32  ;;  %v341_v63 = vld [vmem:[%s829_s7 + $0x30] sm:$0xff]  ;;  %v340_v1 = vld [vmem:[%s829_s7 + $0x28] sm:$0xff]  ;;  %v470_v32 = vld [vmem:[%s830_s8] ss:$0 sm:$0xff] }
  0x2f   :  { %250 = vmatpush.msrb.mxu0 %v159_v3  ;;  %270 = vmatpush.msrb.mxu1 %v191_v4  ;;  %v357_v0 = vld [vmem:[%s829_s7 + $0xb0] sm:$0xff]  ;;  %v356_v2 = vld [vmem:[%s829_s7 + $0xa8] sm:$0xff]  ;;  %v339_v3 = vld [vmem:[%s829_s7 + $0x20] sm:$0xff] }
  0x30   :  { %328 = vmatpush.msrb.mxu3 %v288_v34  ;;  %v355_v4 = vld [vmem:[%s829_s7 + $0xa0] sm:$0xff]  ;;  %v414_v29 = vld [vmem:[%s831_s9 + $0x10] sm:$0xff] }
  0x31   :  { %251 = vmatpush.msrb.mxu0 %v157_v5  ;;  %271 = vmatpush.msrb.mxu1 %v189_v6  ;;  %v338_v5 = vld [vmem:[%s829_s7 + $0x18] sm:$0xff] }
  0x32   :  { %v354_v6 = vld [vmem:[%s829_s7 + $0x98] sm:$0xff] }
  0x33   :  { %252 = vmatpush.msrb.mxu0 %v155_v7  ;;  %272 = vmatpush.msrb.mxu1 %v187_v8  ;;  %v337_v7 = vld [vmem:[%s829_s7 + $0x10] sm:$0xff] }
  0x34   :  { %v353_v8 = vld [vmem:[%s829_s7 + $0x90] sm:$0xff] }
  0x35   :  { %253 = vmatpush.msrb.mxu0 %v153_v9  ;;  %273 = vmatpush.msrb.mxu1 %v185_v10  ;;  %v336_v9 = vld [vmem:[%s829_s7 + $0x8] sm:$0xff] }
  0x36   :  { %v352_v10 = vld [vmem:[%s829_s7 + $0x88] sm:$0xff] }
  0x37   :  { %254 = vmatpush.msrb.mxu0 %v151_v11  ;;  %274 = vmatpush.msrb.mxu1 %v183_v12  ;;  %v335_v11 = vld [vmem:[%s829_s7] sm:$0xff] }
  0x38   :  { %v351_v12 = vld [vmem:[%s829_s7 + $0x80] sm:$0xff] }
  0x39   :  { %255 = vmatpush.msrb.mxu0 %v149_v13  ;;  %275 = vmatpush.msrb.mxu1 %v181_v14  ;;  %v415_v13 = vld [vmem:[%s831_s9 + $0x18] sm:$0xff]  ;;  %v200_v14 = vld [vmem:[%s828_s6] sm:$0x3] }
  0x3b   :  { %256 = vmatpush.msrb.mxu0 %v147_v15  ;;  %276 = vmatpush.msrb.mxu1 %v179_v16  ;;  %v203_v15 = vperm.slane %v200_v14, 1 }
  0x3d   :  { %257 = vmatpush.msrb.mxu0 %v145_v17  ;;  %277 = vmatpush.msrb.mxu1 %v177_v18  ;;  %v202_v17 = vperm.slane %v200_v14, 0 }
  0x3f   :  { %258 = vmatpush.msrb.mxu0 %v143_v19  ;;  %278 = vmatpush.msrb.mxu1 %v175_v23 }
  0x41   :  { %259 = vmatpush.msrb.mxu0 %v141_v22  ;;  %279 = vmatpush.msrb.mxu1 %v173_v27 }
  0x43   :  { %260 = vmatpush.msrb.mxu0 %v139_v26  ;;  %280 = vmatpush.msrb.mxu1 %v171_v31  ;;  %v412_v31 = vld [vmem:[%s831_s9] sm:$0xff] }
  0x45   :  { %261 = vmatpush.msrb.mxu0 %v137_v30  ;;  %281 = vmatpush.msrb.mxu1 %v169_v33  ;;  %v413_v30 = vld [vmem:[%s831_s9 + $0x8] sm:$0xff] }
  0x47   :  { %436 = vmatpush.msra.mxu0 %v415_v13 }
  0x49   :  { %437 = vmatpush.msra.mxu0 %v414_v29 }
  0x4b   :  { %438 = vmatpush.msra.mxu0 %v413_v30 }
  0x4d   :  { %439 = vmatpush.msra.mxu0 %v412_v31 }
  0xa3   :  { %v111_v38 = vpop.f32.mrf.mxu0  ;;  %v131_v39 = vpop.f32.mrf.mxu1 }
  0xa4   :  { %v112_v40 = vadd.f32 %v111_v38, %v90_v36  ;;  %v132_v41 = vadd.f32 %v131_v39, %v91_v37  ;;  %v471_v38 = vld [vmem:[%s832_s10] ss:$0 sm:$0xff] }
  0xa6   :  { %v134_v42 = vmax.f32 %v112_v40, 0.0  ;;  %v135_v43 = vmax.f32 %v132_v41, 0.0 }
  0xa8   :  { %222 = vmatmul.f32.vlgmr.msra.gmra.mxu2 %v134_v42  ;;  %242 = vmatmul.f32.vlgmr.msra.gmra.mxu3 %v135_v43 }
  0xa9   :  { %262 = vmatmul.f32.vlgmr.msrb.gmra.mxu0 %v134_v42  ;;  %282 = vmatmul.f32.vlgmr.msrb.gmra.mxu1 %v135_v43 }
  0xaa   :  { %371 = vmatpush.msra.mxu2 %v350_v44  ;;  %391 = vmatpush.msra.mxu3 %v366_v45 }
  0xac   :  { %372 = vmatpush.msra.mxu2 %v349_v46  ;;  %392 = vmatpush.msra.mxu3 %v365_v47 }
  0xae   :  { %373 = vmatpush.msra.mxu2 %v348_v48  ;;  %393 = vmatpush.msra.mxu3 %v364_v49 }
  0xb0   :  { %463 = vmatmul.msk.f32.vlgmr.msrb.gmra.mxu2 %vm289_vm0, %v286_v50  ;;  %464 = vmatmul.msk.f32.vlgmr.msrb.gmra.mxu3 %vm289_vm0, %v286_v50 }
  0xb1   :  { %374 = vmatpush.msra.mxu2 %v347_v51  ;;  %394 = vmatpush.msra.mxu3 %v363_v52 }
  0xb3   :  { %375 = vmatpush.msra.mxu2 %v346_v53  ;;  %395 = vmatpush.msra.mxu3 %v362_v54 }
  0xb5   :  { %376 = vmatpush.msra.mxu2 %v345_v55  ;;  %396 = vmatpush.msra.mxu3 %v361_v56 }
  0xb7   :  { %377 = vmatpush.msra.mxu2 %v344_v57  ;;  %397 = vmatpush.msra.mxu3 %v360_v58 }
  0xb9   :  { %378 = vmatpush.msra.mxu2 %v343_v59  ;;  %398 = vmatpush.msra.mxu3 %v359_v60 }
  0xbb   :  { %379 = vmatpush.msra.mxu2 %v342_v61  ;;  %399 = vmatpush.msra.mxu3 %v358_v62 }
  0xbd   :  { %380 = vmatpush.msra.mxu2 %v341_v63  ;;  %400 = vmatpush.msra.mxu3 %v357_v0 }
  0xbf   :  { %381 = vmatpush.msra.mxu2 %v340_v1  ;;  %401 = vmatpush.msra.mxu3 %v356_v2 }
  0xc1   :  { %382 = vmatpush.msra.mxu2 %v339_v3  ;;  %402 = vmatpush.msra.mxu3 %v355_v4 }
  0xc3   :  { %383 = vmatpush.msra.mxu2 %v338_v5  ;;  %403 = vmatpush.msra.mxu3 %v354_v6 }
  0xc5   :  { %384 = vmatpush.msra.mxu2 %v337_v7  ;;  %404 = vmatpush.msra.mxu3 %v353_v8 }
  0xc7   :  { %385 = vmatpush.msra.mxu2 %v336_v9  ;;  %405 = vmatpush.msra.mxu3 %v352_v10 }
  0xc9   :  { %386 = vmatpush.msra.mxu2 %v335_v11  ;;  %406 = vmatpush.msra.mxu3 %v351_v12 }
 0x126   :  { %v263_v16 = vpop.f32.mrf.mxu0  ;;  %v283_v22 = vpop.f32.mrf.mxu1 }
 0x127   :  { %v264_v20 = vadd.f32 %v263_v16, %v203_v15 }
 0x129   :  { %v284_v23 = vadd.f32 %v283_v22, %v264_v20 }
 0x12b   :  { %v223_v18 = vpop.f32.mrf.mxu2  ;;  %v243_v19 = vpop.f32.mrf.mxu3 }
 0x12c   :  { %v224_v21 = vadd.f32 %v223_v18, %v202_v17 }
 0x12e   :  { %v244_v24 = vadd.f32 %v243_v19, %v224_v21 }
 0x133   :  { %v310_v25 = vpop.f32.mrf.mxu2  ;;  %v330_v26 = vpop.f32.mrf.mxu3 }
 0x134   :  { %v333_v27 = vmul.f32 %v310_v25, %v244_v24  ;;  %v334_v28 = vmul.f32 %v330_v26, %v284_v23 }
 0x136   :  { %387 = vmatmul.f32.vlgmr.msra.gmra.mxu2 %v333_v27  ;;  %407 = vmatmul.f32.vlgmr.msra.gmra.mxu3 %v334_v28 }
 0x1b9   :  { %v388_v33 = vpop.f32.mrf.mxu2  ;;  %v408_v35 = vpop.f32.mrf.mxu3 }
 0x1ba   :  { %v389_v34 = vadd.f32 %v470_v32, %v388_v33 }
 0x1bc   :  { %v409_v36 = vadd.f32 %v408_v35, %v389_v34 }
 0x1be   :  { %v411_v37 = vmax.f32 %v409_v36, 0.0 }
 0x1c0   :  { %465 = vmatmul.msk.f32.vlgmr.msra.gmra.mxu0 %vm420_vm1, %v411_v37 }
 0x23d   :  { %v441_v39 = vpop.f32.mrf.mxu0 }
 0x23e   :  { %v442_v40 = vadd.f32 %v471_v38, %v441_v39 }
 0x240   :  { %445 = vst.msk [vmem:[#allocation5] sm:$0x3] %vm444_vm2, %v442_v40 }
 0x241   :  { %456 = dma.vmem_to_hbm [thread:$0]  %s452_s4, 32, %s454_s18, [#allocation4]  }
 0x242   :  { %522 = dma.done.wait [#allocation4], 32  }
 0x243   :  { %523 = vsyncadd [#allocation4], 4294967264 }
 0x244   :  { %461 = vsyncpa [#allocation3], 1 }
 0x245   :  { %462 = vsyncpa [#allocation4], 1 }

</bundles_post_ra>
